<compile_context>
chip_gen: v5e
topology: v5e:2x2
jax: 0.10.0
libtpu: 0.0.40
codegen_flags: <defaults>
</compile_context>

<pallas_src>
import functools

import jax
import jax.numpy as jnp
from jax.experimental import pallas as pl
from jax.experimental.pallas import tpu as pltpu


def _round_up(x: int, m: int) -> int:
    return ((x + m - 1) // m) * m


def _make_bc_kernel(n_linear: int, lane_chunk: int):
    """Kernel for an MLP with `n_linear` Linear layers (ReLU between them)."""

    def kernel(*refs):
        # refs = (bc_ref, w1, b1, w2, b2, ..., wN, bN, out_ref)
        bc_ref = refs[0]
        out_ref = refs[-1]                     # (B, Cb, tile_hw) lane-dense tile
        B, Cb, tile_hw = out_ref.shape

        # Tiny MLP, recomputed per grid step; cost hidden behind the HBM writeback.
        x = bc_ref[...].astype(jnp.float32)                   # (B, fc_in)
        for li in range(n_linear):
            w = refs[1 + 2 * li][...].astype(jnp.float32)     # (in, out)
            b = refs[2 + 2 * li][...].astype(jnp.float32)     # (1, out)
            x = jnp.dot(x, w, preferred_element_type=jnp.float32) + b
            if li < n_linear - 1:                             # ReLU on hidden layers
                x = jnp.maximum(x, 0.0)

        # One lane_chunk-wide splat (bounded live vregs), streamed across the tile
        # with static sub-chunk stores -> no spill traffic on the store slot.
        splat = jnp.broadcast_to(
            x[:, :, None], (B, Cb, lane_chunk)).astype(out_ref.dtype)
        n_chunks = tile_hw // lane_chunk
        if n_chunks == 1:
            out_ref[...] = splat
        else:
            for ci in range(n_chunks):         # static loop, <= ~32 iterations
                out_ref[:, :, ci * lane_chunk:(ci + 1) * lane_chunk] = splat

    return kernel


def _plan_tiling(hw: int, b: int, cb: int, itemsize: int, *,
                 max_bytes_per_step: int, split_bytes: int,
                 max_live_vregs: int = 32):
    """Pick (tile_hw, lane_chunk, hw_pad) for the lane-dense output.

    tile_hw      : lanes written per grid step (multiple of lane_chunk)
    lane_chunk   : in-kernel splat width (bounds live vregs)
    hw_pad       : padded lane extent (grid = hw_pad // tile_hw)
    """
    hw128 = _round_up(hw, 128)
    row_bytes = b * cb * itemsize            # output bytes per lane column

    # Lane chunk: keep the materialized splat under ~max_live_vregs f32 vregs.
    vregs_per_128 = max(1, b * (-(-cb // 8)))
    lane_chunk = max(128, (max_live_vregs // vregs_per_128) * 128)
    lane_chunk = min(lane_chunk, hw128)

    # Per-step lane budget from the byte budget (multiple of lane_chunk).
    budget = max(lane_chunk,
                 (max_bytes_per_step // row_bytes) // lane_chunk * lane_chunk)

    tile = min(_round_up(hw128, lane_chunk), budget)
    # Ensure >= 2 grid steps when the output is big enough to split
    # (v7x has 2 TensorCores; the grid axis is "parallel").
    if row_bytes * hw128 >= 2 * split_bytes and hw128 >= 2 * lane_chunk:
        tile = min(tile, _round_up(-(-hw128 // 2), lane_chunk))
    tile = max(tile, lane_chunk)

    if hw % tile == 0:
        hw_pad = hw
    elif hw % lane_chunk == 0:
        # Prefer an exactly dividing tile (no post-kernel slice copy) if it is
        # not much smaller than the preferred tile.
        m = hw // lane_chunk
        k_cap = tile // lane_chunk
        k = next((kk for kk in range(k_cap, 0, -1) if m % kk == 0), 1)
        if k * lane_chunk * 2 >= tile:
            tile = k * lane_chunk
            hw_pad = hw
        else:
            hw_pad = _round_up(hw, tile)
    else:
        # Pad the lane extent up to a tile multiple; wrapper slices it off after.
        hw_pad = _round_up(hw, tile)

    return tile, lane_chunk, hw_pad


def init_bc_params(key, fc_in_channels, bc_hidden_dims, bottleneck_channels,
                   dtype=jnp.float32):
    """Deterministic init mirroring torch.nn.Linear default U(-1/sqrt(fan_in), +)."""
    dims = [fc_in_channels] + list(bc_hidden_dims or []) + [bottleneck_channels]
    params = []
    for d_in, d_out in zip(dims[:-1], dims[1:]):
        key, kw, kb = jax.random.split(key, 3)
        bound = 1.0 / (d_in ** 0.5)
        # stored as (in, out) — already transposed relative to torch's (out, in)
        w = jax.random.uniform(kw, (d_in, d_out), dtype, minval=-bound, maxval=bound)
        b = jax.random.uniform(kb, (1, d_out), dtype, minval=-bound, maxval=bound)
        params.append((w, b))
    return params


@functools.partial(
    jax.jit, static_argnames=("spatial_shape", "max_bytes_per_step", "split_bytes"))
def bc_module_forward(bc, params, spatial_shape,
                      max_bytes_per_step=4 << 20, split_bytes=1 << 20):
    """Pallas implementation of BCModule.forward(bc, spatial_shape)."""
    H, W = spatial_shape
    HW = H * W
    B = bc.shape[0]
    Cb = params[-1][0].shape[1]
    out_dtype = bc.dtype
    itemsize = jnp.dtype(out_dtype).itemsize

    # Cap the per-step budget so the double-buffered tile stays well inside
    # v7x's 64 MiB physical VMEM.
    max_bytes_per_step = min(int(max_bytes_per_step), 16 << 20)

    tile_hw, lane_chunk, hw_pad = _plan_tiling(
        HW, B, Cb, itemsize,
        max_bytes_per_step=max_bytes_per_step, split_bytes=int(split_bytes))
    grid = (hw_pad // tile_hw,)

    flat_inputs = [bc]
    # bc / weights / biases: full-array blocks, constant index maps -> VMEM resident.
    in_specs = [pl.BlockSpec(bc.shape, lambda i: (0, 0))]
    for (w, b) in params:
        flat_inputs += [w, b]
        in_specs += [pl.BlockSpec(w.shape, lambda i: (0, 0)),
                     pl.BlockSpec(b.shape, lambda i: (0, 0))]

    # Lane-dense output: (B, Cb, HW_pad), tiled along the spatial (lane) axis.
    out_shape = jax.ShapeDtypeStruct((B, Cb, hw_pad), out_dtype)
    out_spec = pl.BlockSpec((B, Cb, tile_hw), lambda i: (0, 0, i))

    # Explicit VMEM limit: 2x (double-buffered) output tile + headroom for the
    # tiny resident weights; keeps multi-MiB tiles portable to v5e's 16 MiB default.
    tile_bytes = B * Cb * tile_hw * itemsize
    vmem_limit = int(min(64 << 20, max(32 << 20, 2 * tile_bytes + (4 << 20))))

    out_flat = pl.pallas_call(
        _make_bc_kernel(len(params), lane_chunk),
        grid=grid,
        in_specs=in_specs,
        out_specs=out_spec,
        out_shape=out_shape,
        compiler_params=pltpu.CompilerParams(
            dimension_semantics=("parallel",),   # shards steps across v7x's 2 TCs
            vmem_limit_bytes=vmem_limit),
    )(*flat_inputs)

    if hw_pad != HW:
        out_flat = out_flat[:, :, :HW]
    # Free, contiguous reshape back to NCHW.
    return out_flat.reshape(B, Cb, H, W)


def _reference_forward(bc, params, spatial_shape):
    """Pure-JAX reference matching the PyTorch semantics."""
    H, W = spatial_shape
    x = bc.astype(jnp.float32)
    n = len(params)
    for li, (w, b) in enumerate(params):
        x = x @ w + b
        if li < n - 1:
            x = jnp.maximum(x, 0.0)
    B, Cb = x.shape
    return jnp.broadcast_to(x[:, :, None, None], (B, Cb, H, W)).astype(bc.dtype)


if __name__ == "__main__":
    B = 2
    fc_in_channels = 4
    bc_hidden_dims = [32, 32]
    bottleneck_channels = 8

    key = jax.random.PRNGKey(0)
    key_params, key_bc = jax.random.split(key)
    params = init_bc_params(key_params, fc_in_channels, bc_hidden_dims,
                            bottleneck_channels)
    bc = jax.random.normal(key_bc, (B, fc_in_channels), dtype=jnp.float32)

    # (A) module-typical small bottleneck extent: single block, single chunk.
    sp_a = (16, 16)
    out_a = jax.block_until_ready(bc_module_forward(bc, params, sp_a))
    ref_a = _reference_forward(bc, params, sp_a)
    assert out_a.shape == (B, bottleneck_channels, *sp_a), out_a.shape
    assert jnp.allclose(out_a, ref_a, atol=1e-5, rtol=1e-5), "mismatch (A)"

    # (B) non-tile-multiple extent with a small per-step budget: exercises the
    #     padded multi-step grid + post-kernel slice path (v7x fallback fix).
    sp_b = (64, 48)
    out_b = jax.block_until_ready(
        bc_module_forward(bc, params, sp_b, max_bytes_per_step=128 << 10))
    ref_b = _reference_forward(bc, params, sp_b)
    assert out_b.shape == (B, bottleneck_channels, *sp_b), out_b.shape
    assert jnp.allclose(out_b, ref_b, atol=1e-5, rtol=1e-5), "mismatch (B)"

    # (C) extent large enough to exercise the in-kernel chunked splat/store streaming.
    sp_c = (64, 64)
    out_c = jax.block_until_ready(bc_module_forward(bc, params, sp_c))
    ref_c = _reference_forward(bc, params, sp_c)
    assert out_c.shape == (B, bottleneck_channels, *sp_c), out_c.shape
    assert jnp.allclose(out_c, ref_c, atol=1e-5, rtol=1e-5), "mismatch (C)"

    print("KERNEL_OK")
</pallas_src>

<mosaic_0001>
module attributes {stable_mosaic.version = 11 : i64} {
  func.func @kernel(%arg0: i32, %arg1: memref<2x4xf32, #tpu.memory_space<vmem>>, %arg2: memref<4x32xf32, #tpu.memory_space<vmem>>, %arg3: memref<1x32xf32, #tpu.memory_space<vmem>>, %arg4: memref<32x32xf32, #tpu.memory_space<vmem>>, %arg5: memref<1x32xf32, #tpu.memory_space<vmem>>, %arg6: memref<32x8xf32, #tpu.memory_space<vmem>>, %arg7: memref<1x8xf32, #tpu.memory_space<vmem>>, %arg8: memref<2x8x256xf32, #tpu.memory_space<vmem>>) attributes {dimension_semantics = [#tpu.dimension_semantics<parallel>], iteration_bounds = array<i64: 1>, scalar_prefetch = 0 : i64, scratch_operands = 0 : i64, tpu.core_type = #tpu.core_type<tc>, window_params = [{pipeline_mode = #tpu.pipeline_mode<synchronous>, transform_indices = @transform_0, window_bounds = array<i64: 2, 4>}, {pipeline_mode = #tpu.pipeline_mode<synchronous>, transform_indices = @transform_1, window_bounds = array<i64: 4, 32>}, {pipeline_mode = #tpu.pipeline_mode<synchronous>, transform_indices = @transform_2, window_bounds = array<i64: 1, 32>}, {pipeline_mode = #tpu.pipeline_mode<synchronous>, transform_indices = @transform_3, window_bounds = array<i64: 32, 32>}, {pipeline_mode = #tpu.pipeline_mode<synchronous>, transform_indices = @transform_4, window_bounds = array<i64: 1, 32>}, {pipeline_mode = #tpu.pipeline_mode<synchronous>, transform_indices = @transform_5, window_bounds = array<i64: 32, 8>}, {pipeline_mode = #tpu.pipeline_mode<synchronous>, transform_indices = @transform_6, window_bounds = array<i64: 1, 8>}, {transform_indices = @transform_7, window_bounds = array<i64: 2, 8, 256>}]} {
    %c0 = arith.constant 0 : index
    %c0_0 = arith.constant 0 : index
    %0 = vector.load %arg1[%c0, %c0_0] : memref<2x4xf32, #tpu.memory_space<vmem>>, vector<2x4xf32>
    %c0_1 = arith.constant 0 : index
    %c0_2 = arith.constant 0 : index
    %1 = vector.load %arg2[%c0_1, %c0_2] : memref<4x32xf32, #tpu.memory_space<vmem>>, vector<4x32xf32>
    %c0_3 = arith.constant 0 : index
    %c0_4 = arith.constant 0 : index
    %2 = vector.load %arg3[%c0_3, %c0_4] : memref<1x32xf32, #tpu.memory_space<vmem>>, vector<1x32xf32>
    %cst = arith.constant dense<0.000000e+00> : vector<2x32xf32>
    %3 = tpu.matmul %0, %1, %cst {dimension_numbers = #tpu.dot_dimension_numbers<[1], [0], [0], [1], [0, 0, 1, 1], [], []>} : vector<2x4xf32>, vector<4x32xf32>, vector<2x32xf32> -> vector<2x32xf32>
    %4 = vector.broadcast %2 : vector<1x32xf32> to vector<2x32xf32>
    %5 = arith.addf %3, %4 : vector<2x32xf32>
    %cst_5 = arith.constant 0.000000e+00 : f32
    %6 = vector.broadcast %cst_5 : f32 to vector<2x32xf32>
    %7 = arith.maximumf %5, %6 : vector<2x32xf32>
    %c0_6 = arith.constant 0 : index
    %c0_7 = arith.constant 0 : index
    %8 = vector.load %arg4[%c0_6, %c0_7] : memref<32x32xf32, #tpu.memory_space<vmem>>, vector<32x32xf32>
    %c0_8 = arith.constant 0 : index
    %c0_9 = arith.constant 0 : index
    %9 = vector.load %arg5[%c0_8, %c0_9] : memref<1x32xf32, #tpu.memory_space<vmem>>, vector<1x32xf32>
    %cst_10 = arith.constant dense<0.000000e+00> : vector<2x32xf32>
    %10 = tpu.matmul %7, %8, %cst_10 {dimension_numbers = #tpu.dot_dimension_numbers<[1], [0], [0], [1], [0, 0, 1, 1], [], []>} : vector<2x32xf32>, vector<32x32xf32>, vector<2x32xf32> -> vector<2x32xf32>
    %11 = vector.broadcast %9 : vector<1x32xf32> to vector<2x32xf32>
    %12 = arith.addf %10, %11 : vector<2x32xf32>
    %cst_11 = arith.constant 0.000000e+00 : f32
    %13 = vector.broadcast %cst_11 : f32 to vector<2x32xf32>
    %14 = arith.maximumf %12, %13 : vector<2x32xf32>
    %c0_12 = arith.constant 0 : index
    %c0_13 = arith.constant 0 : index
    %15 = vector.load %arg6[%c0_12, %c0_13] : memref<32x8xf32, #tpu.memory_space<vmem>>, vector<32x8xf32>
    %c0_14 = arith.constant 0 : index
    %c0_15 = arith.constant 0 : index
    %16 = vector.load %arg7[%c0_14, %c0_15] : memref<1x8xf32, #tpu.memory_space<vmem>>, vector<1x8xf32>
    %cst_16 = arith.constant dense<0.000000e+00> : vector<2x8xf32>
    %17 = tpu.matmul %14, %15, %cst_16 {dimension_numbers = #tpu.dot_dimension_numbers<[1], [0], [0], [1], [0, 0, 1, 1], [], []>} : vector<2x32xf32>, vector<32x8xf32>, vector<2x8xf32> -> vector<2x8xf32>
    %18 = vector.broadcast %16 : vector<1x8xf32> to vector<2x8xf32>
    %19 = arith.addf %17, %18 : vector<2x8xf32>
    %20 = vector.shape_cast %19 : vector<2x8xf32> to vector<2x8x1xf32>
    %21 = vector.shape_cast %20 : vector<2x8x1xf32> to vector<2x8x1xf32>
    %22 = vector.broadcast %21 : vector<2x8x1xf32> to vector<2x8x256xf32>
    %c0_17 = arith.constant 0 : index
    %c0_18 = arith.constant 0 : index
    %c0_19 = arith.constant 0 : index
    %23 = vector.load %arg8[%c0_17, %c0_18, %c0_19] : memref<2x8x256xf32, #tpu.memory_space<vmem>>, vector<2x8x256xf32>
    tpu.vector_store %arg8[%c0_17, %c0_18, %c0_19], %22 {strides = array<i32>} : memref<2x8x256xf32, #tpu.memory_space<vmem>>, vector<2x8x256xf32>,
    return
  }
  func.func @transform_0(%arg0: i32) -> (i32, i32) {
    %c0_i32 = arith.constant 0 : i32
    %c0_i32_0 = arith.constant 0 : i32
    %c0_i32_1 = arith.constant 0 : i32
    return %c0_i32, %c0_i32_0 : i32, i32
  }
  func.func @transform_1(%arg0: i32) -> (i32, i32) {
    %c0_i32 = arith.constant 0 : i32
    %c0_i32_0 = arith.constant 0 : i32
    %c0_i32_1 = arith.constant 0 : i32
    return %c0_i32, %c0_i32_0 : i32, i32
  }
  func.func @transform_2(%arg0: i32) -> (i32, i32) {
    %c0_i32 = arith.constant 0 : i32
    %c0_i32_0 = arith.constant 0 : i32
    %c0_i32_1 = arith.constant 0 : i32
    return %c0_i32, %c0_i32_0 : i32, i32
  }
  func.func @transform_3(%arg0: i32) -> (i32, i32) {
    %c0_i32 = arith.constant 0 : i32
    %c0_i32_0 = arith.constant 0 : i32
    %c0_i32_1 = arith.constant 0 : i32
    return %c0_i32, %c0_i32_0 : i32, i32
  }
  func.func @transform_4(%arg0: i32) -> (i32, i32) {
    %c0_i32 = arith.constant 0 : i32
    %c0_i32_0 = arith.constant 0 : i32
    %c0_i32_1 = arith.constant 0 : i32
    return %c0_i32, %c0_i32_0 : i32, i32
  }
  func.func @transform_5(%arg0: i32) -> (i32, i32) {
    %c0_i32 = arith.constant 0 : i32
    %c0_i32_0 = arith.constant 0 : i32
    %c0_i32_1 = arith.constant 0 : i32
    return %c0_i32, %c0_i32_0 : i32, i32
  }
  func.func @transform_6(%arg0: i32) -> (i32, i32) {
    %c0_i32 = arith.constant 0 : i32
    %c0_i32_0 = arith.constant 0 : i32
    %c0_i32_1 = arith.constant 0 : i32
    return %c0_i32, %c0_i32_0 : i32, i32
  }
  func.func @transform_7(%arg0: i32) -> (i32, i32, i32) {
    %c0_i32 = arith.constant 0 : i32
    %c0_i32_0 = arith.constant 0 : i32
    %c0_i32_1 = arith.constant 0 : i32
    return %c0_i32, %c0_i32_0, %arg0 : i32, i32, i32
  }
}

</mosaic_0001>

<bundles_post_ra>
// kernel: bc_module_forward.1
= control target key start
LH: loop header
LB: loop body
LE: loop exit
PB: predicated region body
PF: predicated region fallthrough
CT: control target
= control target key end

     0   :  { %vm36_vm0 = vcmask 1043456   ;;  %vm32_vm1 = vcmask 31744   ;;  %vm69_vm2 = vcmask 261120   ;;  %v126_v14 = vlaneseq  ;;  %s248_s1 = inlined_call_operand.vmem [shape: f32[4,32], index: 1, kind: input, shape index: {}]   ;;  %s249_s0 = inlined_call_operand.vmem [shape: f32[2,4], index: 0, kind: input, shape index: {}]   ;;  %s250_s3 = inlined_call_operand.vmem [shape: f32[32,32], index: 3, kind: input, shape index: {}]   ;;  %s251_s2 = inlined_call_operand.vmem [shape: f32[1,32], index: 2, kind: input, shape index: {}]   ;;  %s252_s4 = inlined_call_operand.vmem [shape: f32[1,32], index: 4, kind: input, shape index: {}]   ;;  %s253_s5 = inlined_call_operand.vmem [shape: f32[32,8], index: 5, kind: input, shape index: {}]   ;;  %s254_s6 = inlined_call_operand.vmem [shape: f32[1,8], index: 6, kind: input, shape index: {}]   ;;  %s255_s7 = inlined_call_operand.vmem [shape: f32[2,8,256], index: 7, kind: output, shape index: {}]  }
   0x1   :  { %v27_v0 = vld [vmem:[%s248_s1] sm:$0xf]  ;;  %v64_v2 = vld [vmem:[%s250_s3 + $0x18] sm:$0xff]  ;;  %v63_v3 = vld [vmem:[%s250_s3 + $0x10] sm:$0xff] }
   0x2   :  { %v26_v1 = vld [vmem:[%s249_s0] sm:$0x3]  ;;  %147 = vmatpush.msk.msra.mxu0 %vm36_vm0, %v27_v0  ;;  %85 = vmatpush.msra.mxu1 %v64_v2  ;;  %v62_v4 = vld [vmem:[%s250_s3 + $0x8] sm:$0xff]  ;;  %v97_v6 = vld [vmem:[%s253_s5 + $0x18] sm:$0xff]  ;;  %v127_v15 = vshrl.u32 %v126_v14, 7 }
   0x3   :  { %148 = vmatmul.msk.f32.vlgmr.msra.gmra.mxu0 %vm32_vm1, %v26_v1  ;;  %v61_v5 = vld [vmem:[%s250_s3] sm:$0xff]  ;;  %117 = vmatpush.msra.mxu2 %v97_v6  ;;  %v96_v11 = vld [vmem:[%s253_s5 + $0x10] sm:$0xff]  ;;  %v95_v12 = vld [vmem:[%s253_s5 + $0x8] sm:$0xff] }
   0x4   :  { %86 = vmatpush.msra.mxu1 %v63_v3  ;;  %v152_v7 = vld [vmem:[%s251_s2] ss:$0 sm:$0xff]  ;;  %151 = vset.pattern.permute.xlu0 %v127_v15 }
   0x5   :  { %118 = vmatpush.msra.mxu2 %v96_v11  ;;  %v94_v13 = vld [vmem:[%s253_s5] sm:$0xff] }
   0x6   :  { %87 = vmatpush.msra.mxu1 %v62_v4  ;;  %v153_v16 = vld [vmem:[%s252_s4] ss:$0 sm:$0xff] }
   0x7   :  { %119 = vmatpush.msra.mxu2 %v95_v12  ;;  %v154_v20 = vld [vmem:[%s254_s6] ss:$0 sm:$0xff] }
   0x8   :  { %88 = vmatpush.msra.mxu1 %v61_v5 }
   0x9   :  { %120 = vmatpush.msra.mxu2 %v94_v13 }
  0x80   :  { %v57_v8 = vpop.f32.mrf.mxu0 }
  0x81   :  { %v58_v9 = vadd.f32 %v152_v7, %v57_v8 }
  0x83   :  { %v60_v10 = vmax.f32 %v58_v9, 0.0 }
  0x85   :  { %149 = vmatmul.msk.f32.vlgmr.msra.gmra.mxu1 %vm69_vm2, %v60_v10 }
 0x102   :  { %v90_v17 = vpop.f32.mrf.mxu1 }
 0x103   :  { %v91_v18 = vadd.f32 %v153_v16, %v90_v17 }
 0x105   :  { %v93_v19 = vmax.f32 %v91_v18, 0.0 }
 0x107   :  { %150 = vmatmul.msk.f32.vlgmr.msra.gmra.mxu2 %vm69_vm2, %v93_v19 }
 0x18a   :  { %v122_v21 = vpop.f32.mrf.mxu2 }
 0x18b   :  { %v123_v22 = vadd.f32 %v154_v20, %v122_v21 }
 0x18d   :  { %v125_v23 = vperm.slane %v123_v22, 0  ;;  %v132_v24 = vperm.slane %v123_v22, 1 }
 0x18f   :  { %130 = vperm.xlu0 %151, %v125_v23  }
 0x197   :  { %137 = vperm.xlu0 %151, %v132_v24  }
 0x201   :  { %v131_v25 = vpop.permute.xlu0 %130 }
 0x202   :  { %139 = vst [vmem:[%s255_s7] sm:$0xff] %v131_v25 }
 0x203   :  { %140 = vst [vmem:[%s255_s7 + $0x8] sm:$0xff] %v131_v25 }
 0x209   :  { %v138_v26 = vpop.permute.xlu0 %137 }
 0x20a   :  { %141 = vst [vmem:[%s255_s7 + $0x10] sm:$0xff] %v138_v26 }
 0x20b   :  { %142 = vst [vmem:[%s255_s7 + $0x18] sm:$0xff] %v138_v26 }

</bundles_post_ra>
